<compile_context>
chip_gen: v7x
topology: tpu7x:2x2x1
jax: 0.10.0
libtpu: 0.0.40
codegen_flags: <defaults>
</compile_context>

<pallas_src>
import functools

import jax
import jax.numpy as jnp
from jax.experimental import pallas as pl
from jax.experimental.pallas import tpu as pltpu

LANE = 128
SUB = 8  # f32 sublanes per vreg


def _dice_sums_kernel(yhat_ref, y_ref, inter_out, a_out, b_out,
                      inter_acc, a_acc, b_acc, *, hw):
    p = pl.program_id(1)                 # parallel spatial split
    s = pl.program_id(2)                 # reduction axis (last grid axis)
    tps = pl.num_programs(2)

    @pl.when(s == 0)
    def _init():
        inter_acc[...] = jnp.zeros_like(inter_acc)
        a_acc[...] = jnp.zeros_like(a_acc)
        b_acc[...] = jnp.zeros_like(b_acc)

    x = yhat_ref[0].astype(jnp.float32)      # (C, ts_rows, 128) logits
    lbl = y_ref[0].astype(jnp.int32)         # (1, ts_rows, 128) labels
    C, ts_rows, _ = x.shape
    acc_rows = inter_acc.shape[1]

    # Flat pixel index of every lane in this tile: masks the ragged spatial
    # tail, partial last tiles and any duplicated (clamped) tile — so no
    # host-side padding of the big tensors is needed.
    g = p * tps + s                          # global tile id (unclamped)
    row = jax.lax.broadcasted_iota(jnp.int32, (1, ts_rows, LANE), 1)
    lane = jax.lax.broadcasted_iota(jnp.int32, (1, ts_rows, LANE), 2)
    col = (g * ts_rows + row) * LANE + lane
    valid = col < hw                         # (1, ts_rows, 128)

    # sigmoid(x) = 0.5*tanh(0.5*x) + 0.5 : a single EUP op per element.
    yh = 0.5 * jnp.tanh(0.5 * x) + 0.5

    ch = jax.lax.broadcasted_iota(jnp.int32, (C, ts_rows, LANE), 0)
    match = jnp.logical_and(lbl == ch, valid)          # one-hot selector

    a_c = jnp.where(valid, yh, 0.0)                    # A_sum contribution
    i_c = jnp.where(match, yh, 0.0)                    # intersection contrib
    b_c = jnp.where(match, 1.0, 0.0)                   # B_sum contribution

    # Fold to a vreg-width accumulator: cross-vreg VPU adds in the hot loop,
    # the XLU cross-lane/sublane reduce only runs once at finalize.
    r = ts_rows // acc_rows
    inter_acc[...] += i_c.reshape(C, r, acc_rows, LANE).sum(axis=1)
    a_acc[...] += a_c.reshape(C, r, acc_rows, LANE).sum(axis=1)
    b_acc[...] += b_c.reshape(C, r, acc_rows, LANE).sum(axis=1)

    @pl.when(s == tps - 1)
    def _finalize():
        def _reduce(acc):
            t = jnp.sum(acc[...], axis=1)              # (C, 128)
            return jnp.sum(t, axis=-1, keepdims=True)  # (C, 1)
        inter_out[...] = _reduce(inter_acc).reshape(1, 1, C, 1)
        a_out[...] = _reduce(a_acc).reshape(1, 1, C, 1)
        b_out[...] = _reduce(b_acc).reshape(1, 1, C, 1)


def _round_down(x, m):
    return (x // m) * m


def _choose_block_rows(C, n_rows):
    """Rows-of-128 per block, targeting ~1 MiB of f32 logits per block.

    The mem-bound roofline saturates around 1–2 MiB blocks; bigger tiles only
    inflate the in-kernel (C, ts_rows, 128) temporaries against v7x's 64 MiB
    physical / 32 MiB scoped VMEM.  A multiple of 32 keeps the sublane tiling
    valid for f32 / bf16 logits and int8 labels.
    """
    cap = (1 << 20) // (C * LANE * 4)
    cap = max(32, _round_down(cap, 32))
    cap = min(cap, 1024)
    return n_rows if n_rows <= cap else cap


def dice_loss(y_hat, y, smooth=0.1, weight=None, block_rows=None):
    bs, C, H, W = y_hat.shape
    HW = H * W
    n_rows = pl.cdiv(HW, LANE)
    hw_pad = n_rows * LANE

    yhat_flat = y_hat.reshape(bs, C, HW)
    y_flat = y.reshape(bs, 1, HW)
    if not jnp.issubdtype(y_flat.dtype, jnp.integer):
        y_flat = y_flat.astype(jnp.int32)
    if hw_pad != HW:
        # Only when H*W is not a multiple of 128 (rare). Values are irrelevant
        # — the kernel masks by the flat pixel index.
        pad = hw_pad - HW
        yhat_flat = jnp.pad(yhat_flat, ((0, 0), (0, 0), (0, pad)))
        y_flat = jnp.pad(y_flat, ((0, 0), (0, 0), (0, pad)))

    # Metadata-only reshape to a sublane-packed layout: spatial fills the
    # (rows, 128) vreg tile; C becomes a leading vreg-major axis.
    yhat4 = yhat_flat.reshape(bs, C, n_rows, LANE)
    y4 = y_flat.reshape(bs, 1, n_rows, LANE)

    ts_rows = block_rows if block_rows is not None else _choose_block_rows(C, n_rows)
    ts_rows = min(int(ts_rows), n_rows)
    if ts_rows < n_rows:
        # Partial blocks must satisfy the sublane tiling for all input dtypes.
        ts_rows = min(n_rows, max(32, _round_down(ts_rows, 32)))
    total_tiles = pl.cdiv(n_rows, ts_rows)
    acc_rows = SUB if ts_rows % SUB == 0 else ts_rows

    # Split the spatial reduction across a second parallel axis when the batch
    # alone cannot keep both v7x TensorCores busy.
    n_split = 2 if (bs == 1 and total_tiles >= 2) else 1
    tiles_per_split = pl.cdiv(total_tiles, n_split)

    def in_map(b, p, s):
        g = jnp.minimum(p * tiles_per_split + s, total_tiles - 1)
        return (b, 0, g, 0)

    def out_map(b, p, s):
        return (b, p, 0, 0)

    kernel = functools.partial(_dice_sums_kernel, hw=HW)
    out_sd = jax.ShapeDtypeStruct((bs, n_split, C, 1), jnp.float32)

    inter, a_sum, b_sum = pl.pallas_call(
        kernel,
        out_shape=(out_sd, out_sd, out_sd),
        grid_spec=pltpu.PrefetchScalarGridSpec(
            num_scalar_prefetch=0,
            grid=(bs, n_split, tiles_per_split),        # reduction axis last
            in_specs=[
                pl.BlockSpec((1, C, ts_rows, LANE), in_map),   # logits tile
                pl.BlockSpec((1, 1, ts_rows, LANE), in_map),   # label tile
            ],
            out_specs=[
                pl.BlockSpec((1, 1, C, 1), out_map),
                pl.BlockSpec((1, 1, C, 1), out_map),
                pl.BlockSpec((1, 1, C, 1), out_map),
            ],
            scratch_shapes=[
                pltpu.VMEM((C, acc_rows, LANE), jnp.float32),  # intersection
                pltpu.VMEM((C, acc_rows, LANE), jnp.float32),  # A_sum
                pltpu.VMEM((C, acc_rows, LANE), jnp.float32),  # B_sum
            ],
        ),
        compiler_params=pltpu.CompilerParams(
            dimension_semantics=("parallel", "parallel", "arbitrary"),
            vmem_limit_bytes=32 * 1024 * 1024,
        ),
    )(yhat4, y4)

    # Combine split partials and finish the dice formula in plain JAX
    # (jit-safe with traced weights).
    inter = jnp.sum(inter[..., 0], axis=1)   # (bs, C)
    a_sum = jnp.sum(a_sum[..., 0], axis=1)
    b_sum = jnp.sum(b_sum[..., 0], axis=1)
    dice = 1.0 - (2.0 * inter + smooth) / (a_sum + b_sum + smooth)

    if weight is None:
        return jnp.sum(dice) / (bs * C)
    w = jnp.asarray(weight, jnp.float32)
    return jnp.sum(dice * w[None, :]) / (jnp.sum(w) * bs)


def _dice_loss_ref(y_hat, y, smooth=0.1, weight=None):
    """Pure-JAX reference matching the PyTorch forward."""
    bs, C, H, W = y_hat.shape
    yh = jax.nn.sigmoid(y_hat.astype(jnp.float32))
    lbl = y.reshape(bs, 1, H, W).astype(jnp.int32)
    onehot = (lbl == jnp.arange(C, dtype=jnp.int32).reshape(1, C, 1, 1)
              ).astype(jnp.float32)
    yh_f = yh.reshape(bs, C, -1)
    oh_f = onehot.reshape(bs, C, -1)
    inter = jnp.sum(yh_f * oh_f, axis=-1)
    a_sum = jnp.sum(yh_f, axis=-1)
    b_sum = jnp.sum(oh_f, axis=-1)
    l = 1.0 - (2.0 * inter + smooth) / (a_sum + b_sum + smooth)
    if weight is None:
        return jnp.sum(l) / (bs * C)
    w = jnp.asarray(weight, jnp.float32)
    return jnp.sum(l * w[None, :]) / (jnp.sum(w) * bs)


if __name__ == "__main__":
    key = jax.random.PRNGKey(0)
    k1, k2 = jax.random.split(key)

    # Primary case: f32 logits / int32 labels.
    bs, C, H, W = 2, 4, 16, 16
    y_hat = jax.random.normal(k1, (bs, C, H, W), dtype=jnp.float32)
    y = jax.random.randint(k2, (bs, 1, H, W), 0, C, dtype=jnp.int32)

    out = jax.block_until_ready(dice_loss(y_hat, y, smooth=0.1))
    ref = _dice_loss_ref(y_hat, y, smooth=0.1)
    assert jnp.allclose(out, ref, rtol=2e-3, atol=2e-3), (out, ref)

    w = [0.2, 0.3, 0.1, 0.4]
    out_w = jax.block_until_ready(dice_loss(y_hat, y, smooth=0.1, weight=w))
    ref_w = _dice_loss_ref(y_hat, y, smooth=0.1, weight=w)
    assert jnp.allclose(out_w, ref_w, rtol=2e-3, atol=2e-3), (out_w, ref_w)

    # Narrow-input path (bf16 logits / int8 labels); bs=1 exercises the
    # parallel spatial split; small block_rows exercises multi-tile reduction
    # and the vreg-width accumulator fold.
    k3, k4 = jax.random.split(jax.random.PRNGKey(1))
    yh2 = jax.random.normal(k3, (1, 4, 128, 128), dtype=jnp.float32)
    y2 = jax.random.randint(k4, (1, 1, 128, 128), 0, 4, dtype=jnp.int32)
    out2 = jax.block_until_ready(
        dice_loss(yh2.astype(jnp.bfloat16), y2.astype(jnp.int8),
                  smooth=0.1, block_rows=32))
    ref2 = _dice_loss_ref(yh2, y2, smooth=0.1)
    assert jnp.allclose(out2, ref2, rtol=2e-2, atol=2e-2), (out2, ref2)

    # Ragged spatial size (H*W not a multiple of 128) exercises the in-kernel
    # tail mask and the non-multiple-of-8 accumulator shape.
    k5, k6 = jax.random.split(jax.random.PRNGKey(2))
    yh3 = jax.random.normal(k5, (2, 3, 20, 20), dtype=jnp.float32)
    y3 = jax.random.randint(k6, (2, 1, 20, 20), 0, 3, dtype=jnp.int32)
    out3 = jax.block_until_ready(dice_loss(yh3, y3, smooth=0.1))
    ref3 = _dice_loss_ref(yh3, y3, smooth=0.1)
    assert jnp.allclose(out3, ref3, rtol=2e-3, atol=2e-3), (out3, ref3)

    print("KERNEL_OK")
</pallas_src>

<mosaic_0001>
module attributes {stable_mosaic.version = 11 : i64} {
  func.func @_dice_sums_kernel(%arg0: i32, %arg1: i32, %arg2: i32, %arg3: memref<1x4x2x128xf32, #tpu.memory_space<vmem>>, %arg4: memref<1x1x2x128xi32, #tpu.memory_space<vmem>>, %arg5: memref<1x1x4x1xf32, #tpu.memory_space<vmem>>, %arg6: memref<1x1x4x1xf32, #tpu.memory_space<vmem>>, %arg7: memref<1x1x4x1xf32, #tpu.memory_space<vmem>>, %arg8: memref<4x2x128xf32, #tpu.memory_space<vmem>>, %arg9: memref<4x2x128xf32, #tpu.memory_space<vmem>>, %arg10: memref<4x2x128xf32, #tpu.memory_space<vmem>>) attributes {dimension_semantics = [#tpu.dimension_semantics<parallel>, #tpu.dimension_semantics<parallel>, #tpu.dimension_semantics<arbitrary>], iteration_bounds = array<i64: 2, 1, 1>, scalar_prefetch = 0 : i64, scratch_operands = 3 : i64, tpu.core_type = #tpu.core_type<tc>, window_params = [{transform_indices = @transform_0, window_bounds = array<i64: 1, 4, 2, 128>}, {transform_indices = @transform_1, window_bounds = array<i64: 1, 1, 2, 128>}, {transform_indices = @transform_2, window_bounds = array<i64: 1, 1, 4, 1>}, {transform_indices = @transform_3, window_bounds = array<i64: 1, 1, 4, 1>}, {transform_indices = @transform_4, window_bounds = array<i64: 1, 1, 4, 1>}]} {
    %c0_i32 = arith.constant 0 : i32
    %0 = arith.cmpi eq, %arg2, %c0_i32 : i32
    %1 = arith.extui %0 : i1 to i32
    %c0_i32_0 = arith.constant 0 : i32
    %2 = arith.cmpi ne, %1, %c0_i32_0 : i32
    scf.if %2 {
      %cst_37 = arith.constant 0.000000e+00 : f32
      %58 = vector.broadcast %cst_37 : f32 to vector<4x2x128xf32>
      %c0_38 = arith.constant 0 : index
      %c0_39 = arith.constant 0 : index
      %c0_40 = arith.constant 0 : index
      %59 = vector.load %arg8[%c0_38, %c0_39, %c0_40] : memref<4x2x128xf32, #tpu.memory_space<vmem>>, vector<4x2x128xf32>
      tpu.vector_store %arg8[%c0_38, %c0_39, %c0_40], %58 {strides = array<i32>} : memref<4x2x128xf32, #tpu.memory_space<vmem>>, vector<4x2x128xf32>,
      %cst_41 = arith.constant 0.000000e+00 : f32
      %60 = vector.broadcast %cst_41 : f32 to vector<4x2x128xf32>
      %c0_42 = arith.constant 0 : index
      %c0_43 = arith.constant 0 : index
      %c0_44 = arith.constant 0 : index
      %61 = vector.load %arg9[%c0_42, %c0_43, %c0_44] : memref<4x2x128xf32, #tpu.memory_space<vmem>>, vector<4x2x128xf32>
      tpu.vector_store %arg9[%c0_42, %c0_43, %c0_44], %60 {strides = array<i32>} : memref<4x2x128xf32, #tpu.memory_space<vmem>>, vector<4x2x128xf32>,
      %cst_45 = arith.constant 0.000000e+00 : f32
      %62 = vector.broadcast %cst_45 : f32 to vector<4x2x128xf32>
      %c0_46 = arith.constant 0 : index
      %c0_47 = arith.constant 0 : index
      %c0_48 = arith.constant 0 : index
      %63 = vector.load %arg10[%c0_46, %c0_47, %c0_48] : memref<4x2x128xf32, #tpu.memory_space<vmem>>, vector<4x2x128xf32>
      tpu.vector_store %arg10[%c0_46, %c0_47, %c0_48], %62 {strides = array<i32>} : memref<4x2x128xf32, #tpu.memory_space<vmem>>, vector<4x2x128xf32>,
    } else {
    }
    %c0 = arith.constant 0 : index
    %c0_1 = arith.constant 0 : index
    %c0_2 = arith.constant 0 : index
    %c0_3 = arith.constant 0 : index
    %3 = vector.load %arg3[%c0, %c0_1, %c0_2, %c0_3] : memref<1x4x2x128xf32, #tpu.memory_space<vmem>>, vector<1x4x2x128xf32>
    %4 = vector.shape_cast %3 : vector<1x4x2x128xf32> to vector<4x2x128xf32>
    %c0_4 = arith.constant 0 : index
    %c0_5 = arith.constant 0 : index
    %c0_6 = arith.constant 0 : index
    %c0_7 = arith.constant 0 : index
    %5 = vector.load %arg4[%c0_4, %c0_5, %c0_6, %c0_7] : memref<1x1x2x128xi32, #tpu.memory_space<vmem>>, vector<1x1x2x128xi32>
    %6 = vector.shape_cast %5 : vector<1x1x2x128xi32> to vector<1x2x128xi32>
    %c1_i32 = arith.constant 1 : i32
    %7 = arith.muli %arg1, %c1_i32 : i32
    %8 = arith.addi %7, %arg2 : i32
    %9 = tpu.iota {dimensions = array<i32: 1>} : vector<1x2x128xi32>
    %10 = tpu.iota {dimensions = array<i32: 2>} : vector<1x2x128xi32>
    %c2_i32 = arith.constant 2 : i32
    %11 = arith.muli %8, %c2_i32 : i32
    %12 = vector.broadcast %11 : i32 to vector<1x2x128xi32>
    %13 = arith.addi %12, %9 : vector<1x2x128xi32>
    %c128_i32 = arith.constant 128 : i32
    %14 = vector.broadcast %c128_i32 : i32 to vector<1x2x128xi32>
    %15 = arith.muli %13, %14 : vector<1x2x128xi32>
    %16 = arith.addi %15, %10 : vector<1x2x128xi32>
    %c256_i32 = arith.constant 256 : i32
    %17 = vector.broadcast %c256_i32 : i32 to vector<1x2x128xi32>
    %18 = arith.cmpi slt, %16, %17 : vector<1x2x128xi32>
    %cst = arith.constant 5.000000e-01 : f32
    %19 = vector.broadcast %cst : f32 to vector<4x2x128xf32>
    %20 = arith.mulf %19, %4 : vector<4x2x128xf32>
    %21 = math.tanh %20 : vector<4x2x128xf32>
    %cst_8 = arith.constant 5.000000e-01 : f32
    %22 = vector.broadcast %cst_8 : f32 to vector<4x2x128xf32>
    %23 = arith.mulf %22, %21 : vector<4x2x128xf32>
    %cst_9 = arith.constant 5.000000e-01 : f32
    %24 = vector.broadcast %cst_9 : f32 to vector<4x2x128xf32>
    %25 = arith.addf %23, %24 : vector<4x2x128xf32>
    %26 = tpu.iota {dimensions = array<i32: 0>} : vector<4x2x128xi32>
    %27 = vector.broadcast %6 : vector<1x2x128xi32> to vector<4x2x128xi32>
    %28 = arith.cmpi eq, %27, %26 : vector<4x2x128xi32>
    %29 = vector.broadcast %18 : vector<1x2x128xi1> to vector<4x2x128xi1>
    %30 = arith.andi %28, %29 : vector<4x2x128xi1>
    %cst_10 = arith.constant 0.000000e+00 : f32
    %31 = vector.shape_cast %18 : vector<1x2x128xi1> to vector<1x2x128xi1>
    %32 = vector.broadcast %31 : vector<1x2x128xi1> to vector<4x2x128xi1>
    %33 = vector.broadcast %cst_10 : f32 to vector<4x2x128xf32>
    %34 = arith.select %32, %25, %33 : vector<4x2x128xi1>, vector<4x2x128xf32>
    %cst_11 = arith.constant 0.000000e+00 : f32
    %35 = vector.broadcast %cst_11 : f32 to vector<4x2x128xf32>
    %36 = arith.select %30, %25, %35 : vector<4x2x128xi1>, vector<4x2x128xf32>
    %cst_12 = arith.constant 1.000000e+00 : f32
    %cst_13 = arith.constant 0.000000e+00 : f32
    %37 = vector.broadcast %cst_12 : f32 to vector<4x2x128xf32>
    %38 = vector.broadcast %cst_13 : f32 to vector<4x2x128xf32>
    %39 = arith.select %30, %37, %38 : vector<4x2x128xi1>, vector<4x2x128xf32>
    %c0_14 = arith.constant 0 : index
    %c0_15 = arith.constant 0 : index
    %c0_16 = arith.constant 0 : index
    %40 = vector.load %arg8[%c0_14, %c0_15, %c0_16] : memref<4x2x128xf32, #tpu.memory_space<vmem>>, vector<4x2x128xf32>
    %41 = vector.shape_cast %36 : vector<4x2x128xf32> to vector<4x1x2x128xf32>
    %cst_17 = arith.constant dense<0.000000e+00> : vector<4x2x128xf32>
    %42 = vector.multi_reduction <add>, %41, %cst_17 [1] : vector<4x1x2x128xf32> to vector<4x2x128xf32>
    %43 = arith.addf %40, %42 : vector<4x2x128xf32>
    %c0_18 = arith.constant 0 : index
    %c0_19 = arith.constant 0 : index
    %c0_20 = arith.constant 0 : index
    %44 = vector.load %arg8[%c0_18, %c0_19, %c0_20] : memref<4x2x128xf32, #tpu.memory_space<vmem>>, vector<4x2x128xf32>
    tpu.vector_store %arg8[%c0_18, %c0_19, %c0_20], %43 {strides = array<i32>} : memref<4x2x128xf32, #tpu.memory_space<vmem>>, vector<4x2x128xf32>,
    %c0_21 = arith.constant 0 : index
    %c0_22 = arith.constant 0 : index
    %c0_23 = arith.constant 0 : index
    %45 = vector.load %arg9[%c0_21, %c0_22, %c0_23] : memref<4x2x128xf32, #tpu.memory_space<vmem>>, vector<4x2x128xf32>
    %46 = vector.shape_cast %34 : vector<4x2x128xf32> to vector<4x1x2x128xf32>
    %cst_24 = arith.constant dense<0.000000e+00> : vector<4x2x128xf32>
    %47 = vector.multi_reduction <add>, %46, %cst_24 [1] : vector<4x1x2x128xf32> to vector<4x2x128xf32>
    %48 = arith.addf %45, %47 : vector<4x2x128xf32>
    %c0_25 = arith.constant 0 : index
    %c0_26 = arith.constant 0 : index
    %c0_27 = arith.constant 0 : index
    %49 = vector.load %arg9[%c0_25, %c0_26, %c0_27] : memref<4x2x128xf32, #tpu.memory_space<vmem>>, vector<4x2x128xf32>
    tpu.vector_store %arg9[%c0_25, %c0_26, %c0_27], %48 {strides = array<i32>} : memref<4x2x128xf32, #tpu.memory_space<vmem>>, vector<4x2x128xf32>,
    %c0_28 = arith.constant 0 : index
    %c0_29 = arith.constant 0 : index
    %c0_30 = arith.constant 0 : index
    %50 = vector.load %arg10[%c0_28, %c0_29, %c0_30] : memref<4x2x128xf32, #tpu.memory_space<vmem>>, vector<4x2x128xf32>
    %51 = vector.shape_cast %39 : vector<4x2x128xf32> to vector<4x1x2x128xf32>
    %cst_31 = arith.constant dense<0.000000e+00> : vector<4x2x128xf32>
    %52 = vector.multi_reduction <add>, %51, %cst_31 [1] : vector<4x1x2x128xf32> to vector<4x2x128xf32>
    %53 = arith.addf %50, %52 : vector<4x2x128xf32>
    %c0_32 = arith.constant 0 : index
    %c0_33 = arith.constant 0 : index
    %c0_34 = arith.constant 0 : index
    %54 = vector.load %arg10[%c0_32, %c0_33, %c0_34] : memref<4x2x128xf32, #tpu.memory_space<vmem>>, vector<4x2x128xf32>
    tpu.vector_store %arg10[%c0_32, %c0_33, %c0_34], %53 {strides = array<i32>} : memref<4x2x128xf32, #tpu.memory_space<vmem>>, vector<4x2x128xf32>,
    %c0_i32_35 = arith.constant 0 : i32
    %55 = arith.cmpi eq, %arg2, %c0_i32_35 : i32
    %56 = arith.extui %55 : i1 to i32
    %c0_i32_36 = arith.constant 0 : i32
    %57 = arith.cmpi ne, %56, %c0_i32_36 : i32
    scf.if %57 {
      %c0_37 = arith.constant 0 : index
      %c0_38 = arith.constant 0 : index
      %c0_39 = arith.constant 0 : index
      %58 = vector.load %arg8[%c0_37, %c0_38, %c0_39] : memref<4x2x128xf32, #tpu.memory_space<vmem>>, vector<4x2x128xf32>
      %cst_40 = arith.constant dense<0.000000e+00> : vector<4x128xf32>
      %59 = vector.multi_reduction <add>, %58, %cst_40 [1] : vector<4x2x128xf32> to vector<4x128xf32>
      %cst_41 = arith.constant dense<0.000000e+00> : vector<4xf32>
      %60 = vector.multi_reduction <add>, %59, %cst_41 [1] : vector<4x128xf32> to vector<4xf32>
      %61 = vector.shape_cast %60 : vector<4xf32> to vector<4x1xf32>
      %62 = vector.shape_cast %61 : vector<4x1xf32> to vector<1x1x4x1xf32>
      %c0_42 = arith.constant 0 : index
      %c0_43 = arith.constant 0 : index
      %c0_44 = arith.constant 0 : index
      %c0_45 = arith.constant 0 : index
      %63 = vector.load %arg5[%c0_42, %c0_43, %c0_44, %c0_45] : memref<1x1x4x1xf32, #tpu.memory_space<vmem>>, vector<1x1x4x1xf32>
      tpu.vector_store %arg5[%c0_42, %c0_43, %c0_44, %c0_45], %62 {strides = array<i32>} : memref<1x1x4x1xf32, #tpu.memory_space<vmem>>, vector<1x1x4x1xf32>,
      %c0_46 = arith.constant 0 : index
      %c0_47 = arith.constant 0 : index
      %c0_48 = arith.constant 0 : index
      %64 = vector.load %arg9[%c0_46, %c0_47, %c0_48] : memref<4x2x128xf32, #tpu.memory_space<vmem>>, vector<4x2x128xf32>
      %cst_49 = arith.constant dense<0.000000e+00> : vector<4x128xf32>
      %65 = vector.multi_reduction <add>, %64, %cst_49 [1] : vector<4x2x128xf32> to vector<4x128xf32>
      %cst_50 = arith.constant dense<0.000000e+00> : vector<4xf32>
      %66 = vector.multi_reduction <add>, %65, %cst_50 [1] : vector<4x128xf32> to vector<4xf32>
      %67 = vector.shape_cast %66 : vector<4xf32> to vector<4x1xf32>
      %68 = vector.shape_cast %67 : vector<4x1xf32> to vector<1x1x4x1xf32>
      %c0_51 = arith.constant 0 : index
      %c0_52 = arith.constant 0 : index
      %c0_53 = arith.constant 0 : index
      %c0_54 = arith.constant 0 : index
      %69 = vector.load %arg6[%c0_51, %c0_52, %c0_53, %c0_54] : memref<1x1x4x1xf32, #tpu.memory_space<vmem>>, vector<1x1x4x1xf32>
      tpu.vector_store %arg6[%c0_51, %c0_52, %c0_53, %c0_54], %68 {strides = array<i32>} : memref<1x1x4x1xf32, #tpu.memory_space<vmem>>, vector<1x1x4x1xf32>,
      %c0_55 = arith.constant 0 : index
      %c0_56 = arith.constant 0 : index
      %c0_57 = arith.constant 0 : index
      %70 = vector.load %arg10[%c0_55, %c0_56, %c0_57] : memref<4x2x128xf32, #tpu.memory_space<vmem>>, vector<4x2x128xf32>
      %cst_58 = arith.constant dense<0.000000e+00> : vector<4x128xf32>
      %71 = vector.multi_reduction <add>, %70, %cst_58 [1] : vector<4x2x128xf32> to vector<4x128xf32>
      %cst_59 = arith.constant dense<0.000000e+00> : vector<4xf32>
      %72 = vector.multi_reduction <add>, %71, %cst_59 [1] : vector<4x128xf32> to vector<4xf32>
      %73 = vector.shape_cast %72 : vector<4xf32> to vector<4x1xf32>
      %74 = vector.shape_cast %73 : vector<4x1xf32> to vector<1x1x4x1xf32>
      %c0_60 = arith.constant 0 : index
      %c0_61 = arith.constant 0 : index
      %c0_62 = arith.constant 0 : index
      %c0_63 = arith.constant 0 : index
      %75 = vector.load %arg7[%c0_60, %c0_61, %c0_62, %c0_63] : memref<1x1x4x1xf32, #tpu.memory_space<vmem>>, vector<1x1x4x1xf32>
      tpu.vector_store %arg7[%c0_60, %c0_61, %c0_62, %c0_63], %74 {strides = array<i32>} : memref<1x1x4x1xf32, #tpu.memory_space<vmem>>, vector<1x1x4x1xf32>,
    } else {
    }
    return
  }
  func.func @transform_0(%arg0: i32, %arg1: i32, %arg2: i32) -> (i32, i32, i32, i32) {
    %c1_i32 = arith.constant 1 : i32
    %0 = arith.muli %arg1, %c1_i32 : i32
    %1 = arith.addi %0, %arg2 : i32
    %c0_i32 = arith.constant 0 : i32
    %2 = arith.minsi %1, %c0_i32 : i32
    %c0_i32_0 = arith.constant 0 : i32
    %c0_i32_1 = arith.constant 0 : i32
    %c0_i32_2 = arith.constant 0 : i32
    return %arg0, %c0_i32_0, %2, %c0_i32_1 : i32, i32, i32, i32
  }
  func.func @transform_1(%arg0: i32, %arg1: i32, %arg2: i32) -> (i32, i32, i32, i32) {
    %c1_i32 = arith.constant 1 : i32
    %0 = arith.muli %arg1, %c1_i32 : i32
    %1 = arith.addi %0, %arg2 : i32
    %c0_i32 = arith.constant 0 : i32
    %2 = arith.minsi %1, %c0_i32 : i32
    %c0_i32_0 = arith.constant 0 : i32
    %c0_i32_1 = arith.constant 0 : i32
    %c0_i32_2 = arith.constant 0 : i32
    return %arg0, %c0_i32_0, %2, %c0_i32_1 : i32, i32, i32, i32
  }
  func.func @transform_2(%arg0: i32, %arg1: i32, %arg2: i32) -> (i32, i32, i32, i32) {
    %c0_i32 = arith.constant 0 : i32
    %c0_i32_0 = arith.constant 0 : i32
    %c0_i32_1 = arith.constant 0 : i32
    return %arg0, %arg1, %c0_i32, %c0_i32_0 : i32, i32, i32, i32
  }
  func.func @transform_3(%arg0: i32, %arg1: i32, %arg2: i32) -> (i32, i32, i32, i32) {
    %c0_i32 = arith.constant 0 : i32
    %c0_i32_0 = arith.constant 0 : i32
    %c0_i32_1 = arith.constant 0 : i32
    return %arg0, %arg1, %c0_i32, %c0_i32_0 : i32, i32, i32, i32
  }
  func.func @transform_4(%arg0: i32, %arg1: i32, %arg2: i32) -> (i32, i32, i32, i32) {
    %c0_i32 = arith.constant 0 : i32
    %c0_i32_0 = arith.constant 0 : i32
    %c0_i32_1 = arith.constant 0 : i32
    return %arg0, %arg1, %c0_i32, %c0_i32_0 : i32, i32, i32, i32
  }
}

</mosaic_0001>

<bundles_post_ra>
// kernel: tpu_custom_call.1
= control target key start
LH: loop header
LB: loop body
LE: loop exit
PB: predicated region body
PF: predicated region fallthrough
CT: control target
= control target key end

     0   :  { %10 = vsyncpa [#allocation6], 0  ;;  %s1280_s0 = inlined_call_operand.hbm [shape: f32[2,4,2,128], index: 0, kind: input, shape index: {}]   ;;  %s1281_s1 = inlined_call_operand.hbm [shape: s32[2,1,2,128], index: 1, kind: input, shape index: {}]   ;;  %s1282_s2 = inlined_call_operand.vmem [shape: f32[2,1,4,1], index: 2, kind: output, shape index: {0}]   ;;  %s1283_s3 = inlined_call_operand.vmem [shape: f32[2,1,4,1], index: 3, kind: output, shape index: {1}]   ;;  %s1284_s4 = inlined_call_operand.vmem [shape: f32[2,1,4,1], index: 4, kind: output, shape index: {2}]  }
   0x1   :  { %12 = vsyncpa [#allocation6 + $0x1], 0 }
   0x2   :  { %13 = vsyncpa [#allocation8], 0 }
   0x3   :  { %15 = vsyncpa [#allocation8 + $0x1], 0  ;;  %s1035_s15 = smov 0   ;;  %s1037_s16 = smov 0  }
   0x4   :  { %s1039_s17 = smov 0   ;;  %s1041_s18 = smov 0  }
   0x5   :  { %s1043_s19 = smov 0   ;;  %s1045_s20 = smov 0  }
   0x6 LB: > { %s800_s21 = sadd.s32 4294967295, %s1003_s20   ;;  %s40_s22 = sadd.s32 1, %s999_s19  ;;  %s1003_s20 = sphi %s1045_s20, %s21_s20   ;;  %s999_s19 = sphi %s1043_s19, %s1304_s19   ;;  %s995_s18 = sphi %s1041_s18, %s1303_s18   ;;  %s991_s17 = sphi %s1039_s17, %s1302_s17   ;;  %s987_s16 = sphi %s1037_s16, %s1301_s16   ;;  %s983_s15 = sphi %s1035_s15, %s1300_s15  }
   0x7   : > { %p42_p0 = scmp.ge.s32.totalorder %s40_s22, 2  ;;  %s55_s23 = sadd.s32 1, %s991_s17 }
   0x8   : > { %p62_p1 = scmp.ne.s32.totalorder %s991_s17, %s987_s16  ;;  %p63_p2 = scmp.eq.s32.totalorder %s1003_s20, 0 }
   0x9   : > { %s1306_s22 = smov (%p42_p0, %s40_s22), 0  ;;  %p68_p4 = scmp.ne.s32.totalorder %s987_s16, %s983_s15 }
   0xa   : > { %p1071_p3 = por %p63_p2, %p62_p1  ;;  %s50_s25 = ssub.s32 %s999_s19, %s1306_s22 }
   0xb   : > { %p69_p5 = scmp.eq.s32.totalorder %s800_s21, 0  ;;  %p53_p6 = scmp.eq.s32.totalorder %s50_s25, 0 }
   0xc   : > { %p829_p8 = scmp.lt.s32.totalorder %s1003_s20, 2  ;;  %s1087_s28 = sand.u32 1, %s991_s17  }
   0xd   : > { %p1078_p7 = por %p69_p5, %p68_p4  ;;  %s817_s29 = sshll.u32 %s999_s19, 7 }
   0xe   : > { %s1084_s27 = scalar_select %p53_p6, %s991_s17, %s55_s23  }
   0xf   : > { %s1287_s26 = scalar_select %p1078_p7, 1, 0 }
  0x10   : > { %s804_s30 = sshll.u32 %s1087_s28, 3  ;;  %s1094_s7 = scalar_lea.hbm %s1280_s0, %s817_s29 }
  0x11   : > { %s214_s8 = scalar_lea.vmem [#allocation5], %s804_s30  ;;  %p1098_p9 = pnand %p829_p8, %p1071_p3 }
  0x12   : > { %s225_s9 = sshll.u32 %s214_s8, 4  ;;  %s211_s11 = scalar_lea.sflag [#allocation6], %s1087_s28  ;;  %s1102_s9 = int_to_ptr.vmem [resolvable:$true] %s225_s9 }
  0x13   : > { %s889_s12 = scalar_lea.hbm %s1094_s7, 128  ;;  %p891_p11 = pneg %p1098_p9 }
  0x14   : > { %p890_p10 = scmp.ne.s32.totalorder %s1094_s7, %s889_s12  ;;  %s894_s15 = scalar_lea.hbm %s1280_s0, 256 }
  0x15   : > { %p895_p0 = scmp.lt.u32.totalorder %s1094_s7, %s1280_s0  ;;  %p896_p1 = scmp.lt.u32.totalorder %s894_s15, %s889_s12 }
  0x16   : > { %p892_p12 = pnand %p891_p11, %p890_p10  ;;  %p898_p3 = scmp.lt.u32.totalorder %s889_s12, %s1094_s7 }
  0x17   : > { %p897_p2 = por %p896_p1, %p895_p0 }
  0x18   : > { %p893_p13 = pneg %p892_p12 }
  0x19   : > { %p899_p4 = por %p898_p3, %p897_p2 }
  0x1b   : > { %p900_p5 = pnand %p899_p4, %p893_p13 }
  0x1d   : > { %903 = shalt.err (!%p900_p5)
}
  0x1e   : > { %s904_s24 = scalar_lea.vmem %s1102_s9, 128  ;;  %s1005_s25 = smov [#allocation5]  }
  0x1f   : > { %p905_p6 = scmp.ne.s32.totalorder %s1102_s9, %s904_s24  ;;  %s909_s29 = sshll.u32 %s1005_s25, 4  ;;  %s910_s29 = int_to_ptr.vmem [resolvable:$false] %s909_s29 }
  0x20   : > { %s911_s30 = scalar_lea.vmem %s910_s29, 256  ;;  %p912_p12 = scmp.lt.s32.totalorder %s1102_s9, %s910_s29 }
  0x21   : > { %p907_p8 = pnand %p905_p6, %p891_p11  ;;  %p913_p0 = scmp.lt.s32.totalorder %s911_s30, %s904_s24 }
  0x23   : > { %p908_p10 = pneg %p907_p8  ;;  %p914_p1 = por %p913_p0, %p912_p12 }
  0x25   : > { %p915_p2 = pnand %p914_p1, %p908_p10 }
  0x27   : > { %918 = shalt.err (!%p915_p2)
}
  0x28   : > { %s1006_s5 = smov 32   ;;  %s1007_s6 = smov 2  }
  0x29   : > { %825 = dma.hbm_to_vmem [thread:$0]  (!%p1098_p9), %s1094_s7, 128, %s1102_s9, %s211_s11, %s1006_s5, %s1006_s5, %s1007_s6  }
  0x2a   : > { %p809_p13 = scmp.ge.s32.totalorder %s1003_s20, 1  ;;  %p255_p3 = scmp.lt.s32.totalorder %s1003_s20, 3 }
  0x2b   : > { %s807_s8 = sshll.u32 %s1087_s28, 1  ;;  %s808_s13 = sshll.u32 %s999_s19, 5 }
  0x2c   : > { %p1135_p4 = pnand %p809_p13, %p255_p3  ;;  %s239_s14 = scalar_lea.vmem [#allocation7], %s807_s8 }
  0x2d   : > { %s250_s15 = sshll.u32 %s239_s14, 4  ;;  %s1143_s24 = scalar_lea.hbm %s1281_s1, %s808_s13  ;;  %s251_s15 = int_to_ptr.vmem [resolvable:$true] %s250_s15 }
  0x2e   : > { %s1289_s12 = scalar_select %p1135_p4, 1, 0 }
  0x2f   : > { %s236_s7 = scalar_lea.sflag [#allocation8], %s1087_s28  ;;  %s919_s9 = scalar_lea.hbm %s1143_s24, 32 }
  0x30   : > { %p920_p5 = scmp.ne.s32.totalorder %s1143_s24, %s919_s9  ;;  %s924_s29 = scalar_lea.hbm %s1281_s1, 64 }
  0x31   : > { %p925_p10 = scmp.lt.u32.totalorder %s1143_s24, %s1281_s1  ;;  %p926_p12 = scmp.lt.u32.totalorder %s924_s29, %s919_s9 }
  0x32   : > { %p922_p6 = pnand %p920_p5, %p891_p11  ;;  %p928_p1 = scmp.lt.u32.totalorder %s919_s9, %s1143_s24 }
  0x33   : > { %p927_p0 = por %p926_p12, %p925_p10 }
  0x34   : > { %p923_p8 = pneg %p922_p6 }
  0x35   : > { %p929_p2 = por %p928_p1, %p927_p0 }
  0x37   : > { %p930_p13 = pnand %p929_p2, %p923_p8 }
  0x39   : > { %933 = shalt.err (!%p930_p13)
}
  0x3a   : > { %s934_s28 = scalar_lea.vmem %s251_s15, 32  ;;  %s1008_s6 = smov [#allocation7]  }
  0x3b   : > { %p935_p3 = scmp.ne.s32.totalorder %s251_s15, %s934_s28  ;;  %s939_s8 = sshll.u32 %s1008_s6, 4  ;;  %s940_s8 = int_to_ptr.vmem [resolvable:$false] %s939_s8 }
  0x3c   : > { %s941_s13 = scalar_lea.vmem %s940_s8, 64  ;;  %p942_p7 = scmp.lt.s32.totalorder %s251_s15, %s940_s8 }
  0x3d   : > { %p937_p5 = pnand %p935_p3, %p891_p11  ;;  %p943_p4 = scmp.lt.s32.totalorder %s941_s13, %s934_s28 }
  0x3f   : > { %p938_p6 = pneg %p937_p5  ;;  %p944_p10 = por %p943_p4, %p942_p7 }
  0x41   : > { %p945_p12 = pnand %p944_p10, %p938_p6 }
  0x43   : > { %948 = shalt.err (!%p945_p12)
}
  0x44   : > { %828 = dma.hbm_to_vmem [thread:$0]  (!%p1098_p9), %s1143_s24, 32, %s251_s15, %s236_s7  }
  0x45   : > { %p1290_p8 = scmp.ne.s32.totalorder %s1289_s12, 0 }
  0x46   : > { %s261_s14 = sand.u32 (!%p1290_p8), 1, %s987_s16   ;;  %p1291_p11 = scmp.ne.s32.totalorder (!%p1290_p8), %s1287_s26, 0 }
  0x47   : > { %259 = sbr.rel (%p1290_p8) target bundleno = 283 (0x11b), region = 28  ;;  %s810_s21 = sshll.u32 (!%p1290_p8), %s261_s14, 3 }
  0x48   : > { %s262_s23 = scalar_lea.sflag (!%p1290_p8), [#allocation6], %s261_s14  ;;  %s265_s9 = scalar_lea.vmem (!%p1290_p8), [#allocation5], %s810_s21 }
  0x4e   : > { %974 = dma.done.wait (%p1291_p11), %s262_s23, 128  }
  0x4f   : > { %976 = vsyncadd (%p1291_p11), %s262_s23, 4294967168  ;;  %s811_s11 = sshll.u32 %s261_s14, 1  ;;  %s271_s25 = scalar_lea.sflag [#allocation8], %s261_s14 }
  0x50   : > { %s274_s10 = scalar_lea.vmem [#allocation7], %s811_s11 }
  0x51   : > { %978 = dma.done.wait (%p1291_p11), %s271_s25, 32  }
  0x52   : > { %980 = vsyncadd (%p1291_p11), %s271_s25, 4294967264  ;;  %v369_v0 = vlaneseq  ;;  %v1009_v1 = vmov 0.0   ;;  %v363_v6 = vld [vmem:[%s265_s9] sm:$0x3]  ;;  %v364_v7 = vld [vmem:[%s265_s9 + $0x2] sm:$0x3] }
  0x53   : > { %351 = vst [vmem:[#allocation2] sm:$0x3] %v1009_v1  ;;  %352 = vst [vmem:[#allocation2 + $0x2] sm:$0x3] %v1009_v1  ;;  %v365_v8 = vld [vmem:[%s265_s9 + $0x4] sm:$0x3] }
  0x54   : > { %353 = vst [vmem:[#allocation2 + $0x4] sm:$0x3] %v1009_v1  ;;  %354 = vst [vmem:[#allocation2 + $0x6] sm:$0x3] %v1009_v1  ;;  %v370_v2 = vshrl.u32 %v369_v0, 7  ;;  %v372_v3 = vand.u32 127, %v369_v0 }
  0x55   : > { %355 = vst [vmem:[#allocation3] sm:$0x3] %v1009_v1  ;;  %356 = vst [vmem:[#allocation3 + $0x2] sm:$0x3] %v1009_v1  ;;  %v366_v9 = vld [vmem:[%s265_s9 + $0x6] sm:$0x3] }
  0x56   : > { %357 = vst [vmem:[#allocation3 + $0x4] sm:$0x3] %v1009_v1  ;;  %358 = vst [vmem:[#allocation3 + $0x6] sm:$0x3] %v1009_v1  ;;  %v376_v4 = vmul.u32 128, %v370_v2  ;;  %v379_v11 = vmul.f32 0.5, %v363_v6 }
  0x57   : > { %359 = vst [vmem:[#allocation4] sm:$0x3] %v1009_v1  ;;  %360 = vst [vmem:[#allocation4 + $0x2] sm:$0x3] %v1009_v1  ;;  %v367_v10 = vld [vmem:[%s274_s10] sm:$0x3] }
  0x58   : > { %361 = vst [vmem:[#allocation4 + $0x4] sm:$0x3] %v1009_v1  ;;  %362 = vst [vmem:[#allocation4 + $0x6] sm:$0x3] %v1009_v1  ;;  %v1176_v5 = vadd.s32 %v376_v4, %v372_v3  ;;  %v380_v12 = vmul.f32 0.5, %v364_v7  ;;  %v381_v13 = vmul.f32 0.5, %v365_v8  ;;  %881 = vtanh.f32 %v379_v11 }
  0x59   : > { %v382_v14 = vmul.f32 0.5, %v366_v9  ;;  %vm395_vm1 = vcmp.eq.s32.totalorder %v367_v10, 0  ;;  %vm396_vm2 = vcmp.eq.s32.totalorder %v367_v10, 1  ;;  %vm397_vm3 = vcmp.eq.s32.totalorder %v367_v10, 2  ;;  %p326_p7 = scmp.lt.s32.totalorder %s995_s18, 1 }
  0x5a   : > { %vm378_vm0 = vcmp.lt.s32.totalorder %v1176_v5, 256  ;;  %vm398_vm4 = vcmp.eq.s32.totalorder %v367_v10, 3  ;;  %883 = vtanh.f32 %v380_v12  ;;  %v417_v34 = vld [vmem:[#allocation2] sm:$0x3]  ;;  %v418_v37 = vld [vmem:[#allocation2 + $0x2] sm:$0x3] }
  0x5b   : > { %vm1181_vm5 = vmand %vm395_vm1, %vm378_vm0  ;;  %885 = vtanh.f32 %v381_v13  ;;  %vm472_vm9 = vcmask 1041408   ;;  %v419_v53 = vld [vmem:[#allocation2 + $0x4] sm:$0x3]  ;;  %v420_v58 = vld [vmem:[#allocation2 + $0x6] sm:$0x3]  ;;  %vm505_vm10 = vcmask 1041409  }
  0x5c   : > { %vm1187_vm6 = vmand %vm396_vm2, %vm378_vm0  ;;  %v413_v17 = vsel %vm1181_vm5, 1.0, %v1009_v1  ;;  %887 = vtanh.f32 %v382_v14  ;;  %v433_v6 = vld [vmem:[#allocation3] sm:$0x3]  ;;  %v434_v11 = vld [vmem:[#allocation3 + $0x2] sm:$0x3]  ;;  %vm507_vm11 = vcmask 1042434  }
  0x5d   : > { %vm1195_vm7 = vmand %vm397_vm3, %vm378_vm0  ;;  %v414_v19 = vsel %vm1187_vm6, 1.0, %v1009_v1  ;;  %v435_v12 = vld [vmem:[#allocation3 + $0x4] sm:$0x3]  ;;  %vm509_vm12 = vcmask 1043459   ;;  %vm512_vm13 = vcmask 1043456   ;;  %s1308_s18 = smov (!%p326_p7, %s995_s18), 1 }
  0x5e   : > { %v449_v20 = vld [vmem:[#allocation4] sm:$0x3]  ;;  %v450_v21 = vld [vmem:[#allocation4 + $0x2] sm:$0x3]  ;;  %vm1203_vm8 = vmand %vm398_vm4, %vm378_vm0  ;;  %v415_v23 = vsel %vm1195_vm7, 1.0, %v1009_v1  ;;  %s812_s26 = sshll.u32 %s1308_s18, 2 }
  0x5f   : > { %v451_v24 = vld [vmem:[#allocation4 + $0x4] sm:$0x3]  ;;  %v452_v25 = vld [vmem:[#allocation4 + $0x6] sm:$0x3]  ;;  %v457_v26 = vadd.f32 %v449_v20, %v413_v17  ;;  %v458_v27 = vadd.f32 %v450_v21, %v414_v19  ;;  %v416_v28 = vsel %vm1203_vm8, 1.0, %v1009_v1  ;;  %s346_s24 = scalar_lea.vmem %s1284_s4, %s812_s26  ;;  %vm516_vm14 = vcmask 3072   ;;  %s332_s30 = scalar_lea.vmem %s1282_s2, %s812_s26 }
  0x60   : > { %v459_v29 = vadd.f32 %v451_v24, %v415_v23  ;;  %v460_v30 = vadd.f32 %v452_v25, %v416_v28  ;;  %v436_v17 = vld [vmem:[#allocation3 + $0x6] sm:$0x3]  ;;  %s339_s6 = scalar_lea.vmem %s1283_s3, %s812_s26 }
  0x61   : > { %461 = vst [vmem:[#allocation4] sm:$0x3] %v457_v26  ;;  %462 = vst [vmem:[#allocation4 + $0x2] sm:$0x3] %v458_v27 }
  0x62   : > { %463 = vst [vmem:[#allocation4 + $0x4] sm:$0x3] %v459_v29  ;;  %464 = vst [vmem:[#allocation4 + $0x6] sm:$0x3] %v460_v30  ;;  %v882_v31 = vpop.eup %881 }
  0x63   : > { %v387_v33 = vmul.f32 0.5, %v882_v31 }
  0x64   : > { %v884_v32 = vpop.eup %883 }
  0x65   : > { %v886_v35 = vpop.eup %885  ;;  %v388_v36 = vmul.f32 0.5, %v884_v32  ;;  %v391_v42 = vadd.f32 0.5, %v387_v33 }
  0x66   : > { %v888_v40 = vpop.eup %887  ;;  %v389_v41 = vmul.f32 0.5, %v886_v35 }
  0x67   : > { %v390_v46 = vmul.f32 0.5, %v888_v40  ;;  %v392_v47 = vadd.f32 0.5, %v388_v36  ;;  %v409_v52 = vsel %vm1181_vm5, %v391_v42, 0.0  ;;  %v405_v10 = vsel %vm378_vm0, %v391_v42, 0.0 }
  0x68   : > { %v562_v38 = vld [vmem:[#allocation4] sm:$0x3]  ;;  %v563_v39 = vld [vmem:[#allocation4 + $0x2] sm:$0x3]  ;;  %v393_v51 = vadd.f32 0.5, %v389_v41  ;;  %v425_v59 = vadd.f32 %v417_v34, %v409_v52  ;;  %v441_v21 = vadd.f32 %v433_v6, %v405_v10 }
  0x69   : > { %v564_v43 = vld [vmem:[#allocation4 + $0x4] sm:$0x3]  ;;  %v566_v44 = vsel %vm472_vm9, %v562_v38, 0.0  ;;  %v573_v45 = vsel %vm472_vm9, %v563_v39, 0.0  ;;  %v565_v48 = vld [vmem:[#allocation4 + $0x6] sm:$0x3] }
  0x6a   : > { %v567_v49 = vrot.slane %v566_v44, 4  ;;  %v574_v50 = vrot.slane %v573_v45, 4  ;;  %v580_v54 = vsel %vm472_vm9, %v564_v43, 0.0  ;;  %v587_v55 = vsel %vm472_vm9, %v565_v48, 0.0  ;;  %429 = vst [vmem:[#allocation2] sm:$0x3] %v425_v59 }
  0x6b   : > { %v394_v56 = vadd.f32 0.5, %v390_v46  ;;  %v410_v57 = vsel %vm1187_vm6, %v392_v47, 0.0  ;;  %v411_v61 = vsel %vm1195_vm7, %v393_v51, 0.0  ;;  %v581_v0 = vrot.slane %v580_v54, 4  ;;  %445 = vst [vmem:[#allocation3] sm:$0x3] %v441_v21 }
  0x6c   : > { %v568_v60 = vadd.f32 %v567_v49, %v566_v44  ;;  %v426_v62 = vadd.f32 %v418_v37, %v410_v57  ;;  %v575_v63 = vadd.f32 %v574_v50, %v573_v45  ;;  %v427_v2 = vadd.f32 %v419_v53, %v411_v61 }
  0x6d   : > { %v412_v1 = vsel %vm1203_vm8, %v394_v56, 0.0  ;;  %v588_v4 = vrot.slane %v587_v55, 4  ;;  %v582_v9 = vadd.f32 %v581_v0, %v580_v54  ;;  %v406_v15 = vsel %vm378_vm0, %v392_v47, 0.0 }
  0x6e   : > { %v569_v3 = vrot.slane %v568_v60, 2  ;;  %v428_v7 = vadd.f32 %v420_v58, %v412_v1  ;;  %430 = vst [vmem:[#allocation2 + $0x2] sm:$0x3] %v426_v62  ;;  %v576_v8 = vrot.slane %v575_v63, 2  ;;  %431 = vst [vmem:[#allocation2 + $0x4] sm:$0x3] %v427_v2  ;;  %v442_v24 = vadd.f32 %v434_v11, %v406_v15 }
  0x6f   : > { %v589_v14 = vadd.f32 %v588_v4, %v587_v55  ;;  %v407_v16 = vsel %vm378_vm0, %v393_v51, 0.0  ;;  %v583_v19 = vrot.slane %v582_v9, 2  ;;  %v408_v20 = vsel %vm378_vm0, %v394_v56, 0.0 }
  0x70   : > { %v570_v13 = vadd.f32 %v569_v3, %v568_v60  ;;  %432 = vst [vmem:[#allocation2 + $0x6] sm:$0x3] %v428_v7  ;;  %v577_v18 = vadd.f32 %v576_v8, %v575_v63  ;;  %v443_v25 = vadd.f32 %v435_v12, %v407_v16  ;;  %v444_v28 = vadd.f32 %v436_v17, %v408_v20 }
  0x71   : > { %v590_v23 = vrot.slane %v589_v14, 2  ;;  %v584_v27 = vadd.f32 %v583_v19, %v582_v9  ;;  %446 = vst [vmem:[#allocation3 + $0x2] sm:$0x3] %v442_v24  ;;  %v468_v31 = vld [vmem:[#allocation2] sm:$0x3] }
  0x72   : > { %v571_v22 = vrot.slane %v570_v13, 1  ;;  %v578_v26 = vrot.slane %v577_v18, 1  ;;  %447 = vst [vmem:[#allocation3 + $0x4] sm:$0x3] %v443_v25  ;;  %448 = vst [vmem:[#allocation3 + $0x6] sm:$0x3] %v444_v28 }
  0x73   : > { %v591_v30 = vadd.f32 %v590_v23, %v589_v14  ;;  %v585_v33 = vrot.slane %v584_v27, 1  ;;  %v473_v5 = vsel %vm472_vm9, %v468_v31, 0.0  ;;  %v518_v52 = vld [vmem:[#allocation3] sm:$0x3] }
  0x74   : > { %v572_v29 = vadd.f32 %v571_v22, %v570_v13  ;;  %v579_v32 = vadd.f32 %v578_v26, %v577_v18  ;;  %v474_v37 = vrot.slane %v473_v5, 4  ;;  %v522_v61 = vsel %vm472_vm9, %v518_v52, 0.0 }
  0x75   : > { %v469_v34 = vld [vmem:[#allocation2 + $0x2] sm:$0x3]  ;;  %v592_v35 = vrot.slane %v591_v30, 1  ;;  %v470_v36 = vld [vmem:[#allocation2 + $0x4] sm:$0x3]  ;;  %v586_v39 = vadd.f32 %v585_v33, %v584_v27  ;;  %v523_v1 = vrot.slane %v522_v61, 4 }
  0x76   : > { %v480_v38 = vsel %vm472_vm9, %v469_v34, 0.0  ;;  %v598_v40 = vsel %vm505_vm10, %v579_v32, %v572_v29  ;;  %v487_v43 = vsel %vm472_vm9, %v470_v36, 0.0  ;;  %v475_v45 = vadd.f32 %v474_v37, %v473_v5 }
  0x77   : > { %v471_v41 = vld [vmem:[#allocation2 + $0x6] sm:$0x3]  ;;  %v481_v42 = vrot.slane %v480_v38, 4  ;;  %v593_v44 = vadd.f32 %v592_v35, %v591_v30  ;;  %v488_v46 = vrot.slane %v487_v43, 4  ;;  %v599_v48 = vsel %vm507_vm11, %v586_v39, %v598_v40 }
  0x78   : > { %v494_v47 = vsel %vm472_vm9, %v471_v41, 0.0  ;;  %v476_v53 = vrot.slane %v475_v45, 2  ;;  %v519_v56 = vld [vmem:[#allocation3 + $0x2] sm:$0x3]  ;;  %v524_v10 = vadd.f32 %v523_v1, %v522_v61 }
  0x79   : > { %v482_v49 = vadd.f32 %v481_v42, %v480_v38  ;;  %v495_v50 = vrot.slane %v494_v47, 4  ;;  %v600_v51 = vsel %vm509_vm12, %v593_v44, %v599_v48  ;;  %v489_v54 = vadd.f32 %v488_v46, %v487_v43  ;;  %v520_v57 = vld [vmem:[#allocation3 + $0x4] sm:$0x3]  ;;  %v521_v60 = vld [vmem:[#allocation3 + $0x6] sm:$0x3] }
  0x7a   : > { %v602_v55 = vsel %vm512_vm13, %v600_v51, 0.0  ;;  %v529_v62 = vsel %vm472_vm9, %v519_v56, 0.0  ;;  %v477_v63 = vadd.f32 %v476_v53, %v475_v45  ;;  %v536_v6 = vsel %vm472_vm9, %v520_v57, 0.0 }
  0x7b   : > { %v483_v58 = vrot.slane %v482_v49, 2  ;;  %v496_v59 = vadd.f32 %v495_v50, %v494_v47  ;;  %603 = vadd.xlane.f32.xlu1 %v602_v55  ;;  %v490_v0 = vrot.slane %v489_v54, 2  ;;  %v530_v2 = vrot.slane %v529_v62, 4 }
  0x7c   : > { %v543_v7 = vsel %vm472_vm9, %v521_v60, 0.0  ;;  %v478_v8 = vrot.slane %v477_v63, 1  ;;  %v537_v14 = vrot.slane %v536_v6, 4  ;;  %v525_v18 = vrot.slane %v524_v10, 2 }
  0x7d   : > { %v484_v3 = vadd.f32 %v483_v58, %v482_v49  ;;  %v497_v4 = vrot.slane %v496_v59, 2  ;;  %v491_v9 = vadd.f32 %v490_v0, %v489_v54  ;;  %v531_v11 = vadd.f32 %v530_v2, %v529_v62 }
  0x7e   : > { %v544_v15 = vrot.slane %v543_v7, 4  ;;  %v479_v16 = vadd.f32 %v478_v8, %v477_v63  ;;  %v538_v22 = vadd.f32 %v537_v14, %v536_v6  ;;  %v526_v25 = vadd.f32 %v525_v18, %v524_v10 }
  0x7f   : > { %v485_v12 = vrot.slane %v484_v3, 1  ;;  %v498_v13 = vadd.f32 %v497_v4, %v496_v59  ;;  %v492_v17 = vrot.slane %v491_v9, 1  ;;  %v532_v19 = vrot.slane %v531_v11, 2 }
  0x80   : > { %v545_v23 = vadd.f32 %v544_v15, %v543_v7  ;;  %v539_v29 = vrot.slane %v538_v22, 2  ;;  %v527_v32 = vrot.slane %v526_v25, 1 }
  0x81   : > { %v486_v20 = vadd.f32 %v485_v12, %v484_v3  ;;  %v499_v21 = vrot.slane %v498_v13, 1  ;;  %v493_v24 = vadd.f32 %v492_v17, %v491_v9  ;;  %v533_v26 = vadd.f32 %v532_v19, %v531_v11 }
  0x82   : > { %v546_v30 = vrot.slane %v545_v23, 2  ;;  %v540_v5 = vadd.f32 %v539_v29, %v538_v22  ;;  %v528_v37 = vadd.f32 %v527_v32, %v526_v25 }
  0x83   : > { %v500_v27 = vadd.f32 %v499_v21, %v498_v13  ;;  %v506_v28 = vsel %vm505_vm10, %v486_v20, %v479_v16  ;;  %v534_v33 = vrot.slane %v533_v26, 1 }
  0x84   : > { %v508_v31 = vsel %vm507_vm11, %v493_v24, %v506_v28  ;;  %v547_v35 = vadd.f32 %v546_v30, %v545_v23  ;;  %v541_v39 = vrot.slane %v540_v5, 1 }
  0x85   : > { %v510_v34 = vsel %vm509_vm12, %v500_v27, %v508_v31  ;;  %v535_v38 = vadd.f32 %v534_v33, %v533_v26 }
  0x86   : > { %v513_v36 = vsel %vm512_vm13, %v510_v34, 0.0  ;;  %v548_v40 = vrot.slane %v547_v35, 1  ;;  %v542_v42 = vadd.f32 %v541_v39, %v540_v5 }
  0x87   : > { %514 = vadd.xlane.f32.xlu0 %v513_v36  ;;  %v554_v41 = vsel %vm505_vm10, %v535_v38, %v528_v37 }
  0x88   : > { %v549_v43 = vadd.f32 %v548_v40, %v547_v35  ;;  %v555_v44 = vsel %vm507_vm11, %v542_v42, %v554_v41 }
  0x8a   : > { %v556_v45 = vsel %vm509_vm12, %v549_v43, %v555_v44 }
  0x8b   : > { %v558_v46 = vsel %vm512_vm13, %v556_v45, 0.0 }
  0x8c   : > { %559 = vadd.xlane.f32.xlu0 %v558_v46 }
 0x108   : > { %v604_v47 = vpop.xlane.xlu1 %603 }
 0x109   : > { %605 = vst.msk [vmem:[%s346_s24] sm:$0xf] %vm516_vm14, %v604_v47 }
 0x114   : > { %v515_v48 = vpop.xlane.xlu0 %514 }
 0x115   : > { %517 = vst.msk [vmem:[%s332_s30] sm:$0xf] %vm516_vm14, %v515_v48 }
 0x119   : > { %v560_v49 = vpop.xlane.xlu0 %559 }
 0x11a   : > { %561 = vst.msk [vmem:[%s339_s6] sm:$0xf] %vm516_vm14, %v560_v49 }
 0x11b PF: > { %s21_s20 = sadd.s32 1, %s1003_s20   ;;  %s1300_s15 = smov %s987_s16 }
 0x11c   : > { %p18_p9 = scmp.ge.s32.totalorder %s21_s20, 4   ;;  %s1301_s16 = smov %s991_s17 }
 0x11d   : > { %s1302_s17 = smov %s1084_s27  ;;  %s1303_s18 = smov %s999_s19 }
 0x11e   : > { %s1304_s19 = smov %s1306_s22  ;;  %20 = sbr.rel (!%p18_p9) target bundleno = 6 (0x6), region = 113 }
 0x125   :  { %671 = vsyncpa [#allocation6], 1 }
 0x126   :  { %673 = vsyncpa [#allocation6 + $0x1], 1 }
 0x127   :  { %674 = vsyncpa [#allocation8], 1 }
 0x128   :  { %676 = vsyncpa [#allocation8 + $0x1], 1 }

</bundles_post_ra>
